<compile_context>
chip_gen: v5e
topology: v5e:2x2
jax: 0.10.0
libtpu: 0.0.40
codegen_flags: <defaults>
</compile_context>

<pallas_src>
import functools

import jax
import jax.numpy as jnp
from jax.experimental import pallas as pl
from jax.experimental.pallas import tpu as pltpu


def _round_up(x, m):
    return (x + m - 1) // m * m


def _codebook2_kernel(scale,
                      z_ref, wqa_ref, bqa_ref, wbd_ref, esq_ref, ebd_ref,
                      wpq_ref, bpq_ref,
                      zq_ref, stats_ref):
    tm = z_ref.shape[0]
    two_l = wqa_ref.shape[1]
    lat = two_l // 2
    two_k = wbd_ref.shape[1]
    k = two_k // 2

    z = z_ref[...].astype(jnp.float32)                                      # (TM, Din)

    # quant_act: Linear(input_dim -> 2*latent_dim)
    h = jnp.dot(z, wqa_ref[...], preferred_element_type=jnp.float32) + bqa_ref[...]

    # Fused distance cross-terms for both codebooks in one MXU pass.
    # ||z_half||^2 is constant per row within each half, so it does not affect argmin.
    d = esq_ref[...] - 2.0 * jnp.dot(h, wbd_ref[...],
                                     preferred_element_type=jnp.float32)    # (TM, 2K)

    lane = jax.lax.broadcasted_iota(jnp.int32, (tm, two_k), 1)
    big = jnp.float32(1e30)
    first_half = lane < k
    d1 = jnp.where(first_half, d, big)
    d2 = jnp.where(first_half, big, d)

    idx1 = jnp.argmin(d1, axis=1, keepdims=True).astype(jnp.int32)          # (TM, 1)
    idx2 = jnp.argmin(d2, axis=1, keepdims=True).astype(jnp.int32) - k
    dmin1 = jnp.min(d1, axis=1, keepdims=True)
    dmin2 = jnp.min(d2, axis=1, keepdims=True)

    # ||z_half||^2 (only needed for the loss): one full + one masked lane reduce.
    hsq = h * h
    lane_h = jax.lax.broadcasted_iota(jnp.int32, (tm, two_l), 1)
    zsq1 = jnp.sum(jnp.where(lane_h < lat, hsq, 0.0), axis=1, keepdims=True)
    zsq2 = jnp.sum(hsq, axis=1, keepdims=True) - zsq1

    # Forward loss value: encoder_qloss + beta*code_qloss = (1+beta)*mean((zq-z)^2, -1).
    l1 = scale * (dmin1 + zsq1)
    l2 = scale * (dmin2 + zsq2)

    # Fused one-hot gather for both codebooks: (TM, 2K) @ blockdiag(e1, e2) (2K, 2L)
    # directly yields the concatenated [zq1 | zq2] (gather done on the MXU, no concat).
    onehot = ((lane == idx1) | (lane == (idx2 + k))).astype(jnp.float32)
    zq_cat = jnp.dot(onehot, ebd_ref[...], preferred_element_type=jnp.float32)

    # Straight-through estimator is identity in the forward pass.
    out = jnp.dot(zq_cat, wpq_ref[...], preferred_element_type=jnp.float32) + bpq_ref[...]
    zq_ref[...] = out.astype(zq_ref.dtype)

    # Pack all per-token scalars into one (TM, 8) slab: [l1, l2, idx1, idx2, 0, 0, 0, 0].
    # (K < 2^24 so the indices are exactly representable in f32.)
    lane8 = jax.lax.broadcasted_iota(jnp.int32, (tm, 8), 1)
    stats = jnp.where(lane8 == 0, l1, 0.0)
    stats = jnp.where(lane8 == 1, l2, stats)
    stats = jnp.where(lane8 == 2, idx1.astype(jnp.float32), stats)
    stats = jnp.where(lane8 == 3, idx2.astype(jnp.float32), stats)
    stats_ref[...] = stats


def codebook2_forward(z, params, beta, tile_m=512):
    """z: (B, N, input_dim) float32. Returns (z_q, (idx1, idx2), loss, loss_dict)."""
    wqa, bqa, e1, e2, wpq, bpq = params
    B, N, Din = z.shape
    M = B * N
    K, L = e1.shape
    Dout = wpq.shape[1]

    # ---- tiny fused constants precomputed once outside the kernel ----
    wbd = jnp.zeros((2 * L, 2 * K), jnp.float32)
    wbd = wbd.at[:L, :K].set(e1.T).at[L:, K:].set(e2.T)          # blockdiag(e1^T, e2^T)
    ebd = jnp.zeros((2 * K, 2 * L), jnp.float32)
    ebd = ebd.at[:K, :L].set(e1).at[K:, L:].set(e2)              # blockdiag(e1, e2)
    esq = jnp.concatenate([jnp.sum(e1 * e1, axis=1),
                           jnp.sum(e2 * e2, axis=1)])[None, :]   # (1, 2K)

    # ---- tile the token axis ----
    z_flat = z.reshape(M, Din).astype(jnp.float32)
    TM = min(tile_m, _round_up(M, 8))
    M_pad = _round_up(M, TM)
    if M_pad != M:
        z_flat = jnp.pad(z_flat, ((0, M_pad - M), (0, 0)))
    grid = (M_pad // TM,)

    scale = (1.0 + float(beta)) / float(L)
    kernel = functools.partial(_codebook2_kernel, scale)

    def _resident(shape):                      # full-array block, VMEM-resident across steps
        return pl.BlockSpec(shape, lambda i: (0, 0))

    in_specs = [
        pl.BlockSpec((TM, Din), lambda i: (i, 0)),   # streamed activation tile
        _resident(wqa.shape),
        _resident((1, 2 * L)),
        _resident(wbd.shape),
        _resident(esq.shape),
        _resident(ebd.shape),
        _resident(wpq.shape),
        _resident((1, Dout)),
    ]
    out_shapes = (
        jax.ShapeDtypeStruct((M_pad, Dout), jnp.float32),   # z_q
        jax.ShapeDtypeStruct((M_pad, 8), jnp.float32),      # [l1, l2, idx1, idx2, pad]
    )
    out_specs = (
        pl.BlockSpec((TM, Dout), lambda i: (i, 0)),
        pl.BlockSpec((TM, 8), lambda i: (i, 0)),
    )

    flops = 2 * M_pad * (Din * 2 * L + 2 * L * 2 * K + 2 * K * 2 * L + 2 * L * Dout)
    bytes_accessed = 4 * (M_pad * (Din + Dout + 8)
                          + wqa.size + 2 * L + wbd.size + esq.size + ebd.size
                          + wpq.size + Dout)

    zq_full, stats = pl.pallas_call(
        kernel,
        grid=grid,
        out_shape=out_shapes,
        in_specs=in_specs,
        out_specs=out_specs,
        compiler_params=pltpu.CompilerParams(dimension_semantics=("parallel",)),
        cost_estimate=pl.CostEstimate(flops=flops, transcendentals=0,
                                      bytes_accessed=bytes_accessed),
    )(z_flat, wqa, bqa.reshape(1, -1), wbd, esq, ebd, wpq, bpq.reshape(1, -1))

    z_q = zq_full[:M].reshape(B, N, Dout)
    l1 = stats[:M, 0].reshape(B, N)
    l2 = stats[:M, 1].reshape(B, N)
    idx1 = stats[:M, 2].astype(jnp.int32)   # TODO(synk): torch returns int64 indices
    idx2 = stats[:M, 3].astype(jnp.int32)
    loss = 0.5 * (l1 + l2)
    loss_dict = {'q_loss_1': l1, 'q_loss_2': l2}
    return z_q, (idx1, idx2), loss, loss_dict


def _reference_forward(z, params, beta):
    """Pure-JAX transcription of the PyTorch forward (forward values only)."""
    wqa, bqa, e1, e2, wpq, bpq = params
    h = z @ wqa + bqa
    lat = e1.shape[1]
    z1, z2 = h[..., :lat], h[..., lat:]

    def vq(zf, e):
        zfl = zf.reshape(-1, lat)
        d = (jnp.sum(zfl ** 2, 1, keepdims=True) + jnp.sum(e ** 2, 1)
             - 2.0 * zfl @ e.T)
        idx = jnp.argmin(d, axis=1)
        zq = e[idx].reshape(zf.shape)
        l = (1.0 + beta) * jnp.mean((zq - zf) ** 2, -1)
        return zq, idx, l

    zq1, i1, l1 = vq(z1, e1)
    zq2, i2, l2 = vq(z2, e2)
    out = jnp.concatenate([zq1, zq2], -1) @ wpq + bpq
    return out, (i1, i2), 0.5 * (l1 + l2), {'q_loss_1': l1, 'q_loss_2': l2}


if __name__ == "__main__":
    # Small, module-consistent shapes.
    B, N = 2, 8                 # batchsize, res_num
    input_dim = 32
    latent_dim = 16
    num_codebook_vectors = 64
    out_dim = input_dim
    beta = 0.25

    key = jax.random.PRNGKey(0)
    kz, k1, k2, k3, k4, k5, k6 = jax.random.split(key, 7)

    # Deterministic parameter init (shapes from Codebook2.__init__).
    wqa = jax.random.uniform(k1, (input_dim, 2 * latent_dim), jnp.float32, -0.1, 0.1)
    bqa = jax.random.uniform(k2, (2 * latent_dim,), jnp.float32, -0.1, 0.1)
    e1 = jax.random.uniform(k3, (num_codebook_vectors, latent_dim), jnp.float32,
                            -1.0 / num_codebook_vectors, 1.0 / num_codebook_vectors)
    e2 = jax.random.uniform(k4, (num_codebook_vectors, latent_dim), jnp.float32,
                            -1.0 / num_codebook_vectors, 1.0 / num_codebook_vectors)
    wpq = jax.random.uniform(k5, (2 * latent_dim, out_dim), jnp.float32, -0.1, 0.1)
    bpq = jax.random.uniform(k6, (out_dim,), jnp.float32, -0.1, 0.1)
    params = (wqa, bqa, e1, e2, wpq, bpq)

    z = jax.random.normal(kz, (B, N, input_dim), jnp.float32)

    z_q, (idx1, idx2), loss, loss_dict = codebook2_forward(z, params, beta)
    jax.block_until_ready((z_q, idx1, idx2, loss, loss_dict))

    # Correctness check vs. pure-JAX reference.
    rq, (ri1, ri2), rloss, rdict = _reference_forward(z, params, beta)
    assert jnp.allclose(z_q, rq, atol=1e-4), "z_q mismatch"
    assert jnp.all(idx1 == ri1.astype(jnp.int32)), "idx1 mismatch"
    assert jnp.all(idx2 == ri2.astype(jnp.int32)), "idx2 mismatch"
    assert jnp.allclose(loss, rloss, atol=1e-5), "loss mismatch"
    assert jnp.allclose(loss_dict['q_loss_1'], rdict['q_loss_1'], atol=1e-5)
    assert jnp.allclose(loss_dict['q_loss_2'], rdict['q_loss_2'], atol=1e-5)

    print("KERNEL_OK")
</pallas_src>

<mosaic_0001>
module attributes {stable_mosaic.version = 11 : i64} {
  func.func @_codebook2_kernel(%arg0: i32, %arg1: memref<16x32xf32, #tpu.memory_space<vmem>>, %arg2: memref<32x32xf32, #tpu.memory_space<vmem>>, %arg3: memref<1x32xf32, #tpu.memory_space<vmem>>, %arg4: memref<32x128xf32, #tpu.memory_space<vmem>>, %arg5: memref<1x128xf32, #tpu.memory_space<vmem>>, %arg6: memref<128x32xf32, #tpu.memory_space<vmem>>, %arg7: memref<32x32xf32, #tpu.memory_space<vmem>>, %arg8: memref<1x32xf32, #tpu.memory_space<vmem>>, %arg9: memref<16x32xf32, #tpu.memory_space<vmem>>, %arg10: memref<16x8xf32, #tpu.memory_space<vmem>>) attributes {dimension_semantics = [#tpu.dimension_semantics<parallel>], iteration_bounds = array<i64: 1>, scalar_prefetch = 0 : i64, scratch_operands = 0 : i64, tpu.core_type = #tpu.core_type<tc>, window_params = [{transform_indices = @transform_0, window_bounds = array<i64: 16, 32>}, {pipeline_mode = #tpu.pipeline_mode<synchronous>, transform_indices = @transform_1, window_bounds = array<i64: 32, 32>}, {pipeline_mode = #tpu.pipeline_mode<synchronous>, transform_indices = @transform_2, window_bounds = array<i64: 1, 32>}, {pipeline_mode = #tpu.pipeline_mode<synchronous>, transform_indices = @transform_3, window_bounds = array<i64: 32, 128>}, {pipeline_mode = #tpu.pipeline_mode<synchronous>, transform_indices = @transform_4, window_bounds = array<i64: 1, 128>}, {pipeline_mode = #tpu.pipeline_mode<synchronous>, transform_indices = @transform_5, window_bounds = array<i64: 128, 32>}, {pipeline_mode = #tpu.pipeline_mode<synchronous>, transform_indices = @transform_6, window_bounds = array<i64: 32, 32>}, {pipeline_mode = #tpu.pipeline_mode<synchronous>, transform_indices = @transform_7, window_bounds = array<i64: 1, 32>}, {transform_indices = @transform_8, window_bounds = array<i64: 16, 32>}, {transform_indices = @transform_9, window_bounds = array<i64: 16, 8>}]} {
    %c0 = arith.constant 0 : index
    %c0_0 = arith.constant 0 : index
    %0 = vector.load %arg1[%c0, %c0_0] : memref<16x32xf32, #tpu.memory_space<vmem>>, vector<16x32xf32>
    %c0_1 = arith.constant 0 : index
    %c0_2 = arith.constant 0 : index
    %1 = vector.load %arg2[%c0_1, %c0_2] : memref<32x32xf32, #tpu.memory_space<vmem>>, vector<32x32xf32>
    %cst = arith.constant dense<0.000000e+00> : vector<16x32xf32>
    %2 = tpu.matmul %0, %1, %cst {dimension_numbers = #tpu.dot_dimension_numbers<[1], [0], [0], [1], [0, 0, 1, 1], [], []>} : vector<16x32xf32>, vector<32x32xf32>, vector<16x32xf32> -> vector<16x32xf32>
    %c0_3 = arith.constant 0 : index
    %c0_4 = arith.constant 0 : index
    %3 = vector.load %arg3[%c0_3, %c0_4] : memref<1x32xf32, #tpu.memory_space<vmem>>, vector<1x32xf32>
    %4 = vector.broadcast %3 : vector<1x32xf32> to vector<16x32xf32>
    %5 = arith.addf %2, %4 : vector<16x32xf32>
    %c0_5 = arith.constant 0 : index
    %c0_6 = arith.constant 0 : index
    %6 = vector.load %arg5[%c0_5, %c0_6] : memref<1x128xf32, #tpu.memory_space<vmem>>, vector<1x128xf32>
    %c0_7 = arith.constant 0 : index
    %c0_8 = arith.constant 0 : index
    %7 = vector.load %arg4[%c0_7, %c0_8] : memref<32x128xf32, #tpu.memory_space<vmem>>, vector<32x128xf32>
    %cst_9 = arith.constant dense<0.000000e+00> : vector<16x128xf32>
    %8 = tpu.matmul %5, %7, %cst_9 {dimension_numbers = #tpu.dot_dimension_numbers<[1], [0], [0], [1], [0, 0, 1, 1], [], []>} : vector<16x32xf32>, vector<32x128xf32>, vector<16x128xf32> -> vector<16x128xf32>
    %cst_10 = arith.constant 2.000000e+00 : f32
    %9 = vector.broadcast %cst_10 : f32 to vector<16x128xf32>
    %10 = arith.mulf %9, %8 : vector<16x128xf32>
    %11 = vector.broadcast %6 : vector<1x128xf32> to vector<16x128xf32>
    %12 = arith.subf %11, %10 : vector<16x128xf32>
    %13 = tpu.iota {dimensions = array<i32: 1>} : vector<16x128xi32>
    %c64_i32 = arith.constant 64 : i32
    %14 = vector.broadcast %c64_i32 : i32 to vector<16x128xi32>
    %15 = arith.cmpi slt, %13, %14 : vector<16x128xi32>
    %cst_11 = arith.constant 1.000000e+30 : f32
    %16 = vector.broadcast %cst_11 : f32 to vector<16x128xf32>
    %17 = arith.select %15, %12, %16 : vector<16x128xi1>, vector<16x128xf32>
    %cst_12 = arith.constant 1.000000e+30 : f32
    %18 = vector.broadcast %cst_12 : f32 to vector<16x128xf32>
    %19 = arith.select %15, %18, %12 : vector<16x128xi1>, vector<16x128xf32>
    %20 = tpu.reduce_index %17 {axis = 1 : i32, kind = #tpu.reduction_kind<arg_min>} : vector<16x128xf32> -> vector<16xi32>
    %21 = vector.shape_cast %20 : vector<16xi32> to vector<16x1xi32>
    %22 = tpu.reduce_index %19 {axis = 1 : i32, kind = #tpu.reduction_kind<arg_min>} : vector<16x128xf32> -> vector<16xi32>
    %23 = vector.shape_cast %22 : vector<16xi32> to vector<16x1xi32>
    %c64_i32_13 = arith.constant 64 : i32
    %24 = vector.broadcast %c64_i32_13 : i32 to vector<16x1xi32>
    %25 = arith.subi %23, %24 : vector<16x1xi32>
    %cst_14 = arith.constant dense<0x7F800000> : vector<16xf32>
    %26 = vector.multi_reduction <minimumf>, %17, %cst_14 [1] : vector<16x128xf32> to vector<16xf32>
    %27 = vector.shape_cast %26 : vector<16xf32> to vector<16x1xf32>
    %cst_15 = arith.constant dense<0x7F800000> : vector<16xf32>
    %28 = vector.multi_reduction <minimumf>, %19, %cst_15 [1] : vector<16x128xf32> to vector<16xf32>
    %29 = vector.shape_cast %28 : vector<16xf32> to vector<16x1xf32>
    %30 = arith.mulf %5, %5 : vector<16x32xf32>
    %31 = tpu.iota {dimensions = array<i32: 1>} : vector<16x32xi32>
    %c16_i32 = arith.constant 16 : i32
    %32 = vector.broadcast %c16_i32 : i32 to vector<16x32xi32>
    %33 = arith.cmpi slt, %31, %32 : vector<16x32xi32>
    %cst_16 = arith.constant 0.000000e+00 : f32
    %34 = vector.broadcast %cst_16 : f32 to vector<16x32xf32>
    %35 = arith.select %33, %30, %34 : vector<16x32xi1>, vector<16x32xf32>
    %cst_17 = arith.constant dense<0.000000e+00> : vector<16xf32>
    %36 = vector.multi_reduction <add>, %35, %cst_17 [1] : vector<16x32xf32> to vector<16xf32>
    %37 = vector.shape_cast %36 : vector<16xf32> to vector<16x1xf32>
    %cst_18 = arith.constant dense<0.000000e+00> : vector<16xf32>
    %38 = vector.multi_reduction <add>, %30, %cst_18 [1] : vector<16x32xf32> to vector<16xf32>
    %39 = vector.shape_cast %38 : vector<16xf32> to vector<16x1xf32>
    %40 = arith.subf %39, %37 : vector<16x1xf32>
    %41 = arith.addf %27, %37 : vector<16x1xf32>
    %cst_19 = arith.constant 7.812500e-02 : f32
    %42 = vector.broadcast %cst_19 : f32 to vector<16x1xf32>
    %43 = arith.mulf %42, %41 : vector<16x1xf32>
    %44 = arith.addf %29, %40 : vector<16x1xf32>
    %cst_20 = arith.constant 7.812500e-02 : f32
    %45 = vector.broadcast %cst_20 : f32 to vector<16x1xf32>
    %46 = arith.mulf %45, %44 : vector<16x1xf32>
    %47 = vector.broadcast %21 : vector<16x1xi32> to vector<16x128xi32>
    %48 = arith.cmpi eq, %13, %47 : vector<16x128xi32>
    %c64_i32_21 = arith.constant 64 : i32
    %49 = vector.broadcast %c64_i32_21 : i32 to vector<16x1xi32>
    %50 = arith.addi %25, %49 : vector<16x1xi32>
    %51 = vector.broadcast %50 : vector<16x1xi32> to vector<16x128xi32>
    %52 = arith.cmpi eq, %13, %51 : vector<16x128xi32>
    %53 = arith.ori %48, %52 : vector<16x128xi1>
    %54 = arith.extui %53 : vector<16x128xi1> to vector<16x128xi32>
    %55 = arith.sitofp %54 : vector<16x128xi32> to vector<16x128xf32>
    %c0_22 = arith.constant 0 : index
    %c0_23 = arith.constant 0 : index
    %56 = vector.load %arg6[%c0_22, %c0_23] : memref<128x32xf32, #tpu.memory_space<vmem>>, vector<128x32xf32>
    %cst_24 = arith.constant dense<0.000000e+00> : vector<16x32xf32>
    %57 = tpu.matmul %55, %56, %cst_24 {dimension_numbers = #tpu.dot_dimension_numbers<[1], [0], [0], [1], [0, 0, 1, 1], [], []>} : vector<16x128xf32>, vector<128x32xf32>, vector<16x32xf32> -> vector<16x32xf32>
    %c0_25 = arith.constant 0 : index
    %c0_26 = arith.constant 0 : index
    %58 = vector.load %arg7[%c0_25, %c0_26] : memref<32x32xf32, #tpu.memory_space<vmem>>, vector<32x32xf32>
    %cst_27 = arith.constant dense<0.000000e+00> : vector<16x32xf32>
    %59 = tpu.matmul %57, %58, %cst_27 {dimension_numbers = #tpu.dot_dimension_numbers<[1], [0], [0], [1], [0, 0, 1, 1], [], []>} : vector<16x32xf32>, vector<32x32xf32>, vector<16x32xf32> -> vector<16x32xf32>
    %c0_28 = arith.constant 0 : index
    %c0_29 = arith.constant 0 : index
    %60 = vector.load %arg8[%c0_28, %c0_29] : memref<1x32xf32, #tpu.memory_space<vmem>>, vector<1x32xf32>
    %61 = vector.broadcast %60 : vector<1x32xf32> to vector<16x32xf32>
    %62 = arith.addf %59, %61 : vector<16x32xf32>
    %c0_30 = arith.constant 0 : index
    %c0_31 = arith.constant 0 : index
    %63 = vector.load %arg9[%c0_30, %c0_31] : memref<16x32xf32, #tpu.memory_space<vmem>>, vector<16x32xf32>
    tpu.vector_store %arg9[%c0_30, %c0_31], %62 {strides = array<i32>} : memref<16x32xf32, #tpu.memory_space<vmem>>, vector<16x32xf32>,
    %64 = tpu.iota {dimensions = array<i32: 1>} : vector<16x8xi32>
    %c0_i32 = arith.constant 0 : i32
    %65 = vector.broadcast %c0_i32 : i32 to vector<16x8xi32>
    %66 = arith.cmpi eq, %64, %65 : vector<16x8xi32>
    %cst_32 = arith.constant 0.000000e+00 : f32
    %67 = vector.shape_cast %43 : vector<16x1xf32> to vector<16x1xf32>
    %68 = vector.broadcast %67 : vector<16x1xf32> to vector<16x8xf32>
    %69 = vector.broadcast %cst_32 : f32 to vector<16x8xf32>
    %70 = arith.select %66, %68, %69 : vector<16x8xi1>, vector<16x8xf32>
    %c1_i32 = arith.constant 1 : i32
    %71 = vector.broadcast %c1_i32 : i32 to vector<16x8xi32>
    %72 = arith.cmpi eq, %64, %71 : vector<16x8xi32>
    %73 = vector.shape_cast %46 : vector<16x1xf32> to vector<16x1xf32>
    %74 = vector.broadcast %73 : vector<16x1xf32> to vector<16x8xf32>
    %75 = arith.select %72, %74, %70 : vector<16x8xi1>, vector<16x8xf32>
    %c2_i32 = arith.constant 2 : i32
    %76 = vector.broadcast %c2_i32 : i32 to vector<16x8xi32>
    %77 = arith.cmpi eq, %64, %76 : vector<16x8xi32>
    %78 = arith.sitofp %21 : vector<16x1xi32> to vector<16x1xf32>
    %79 = vector.shape_cast %78 : vector<16x1xf32> to vector<16x1xf32>
    %80 = vector.broadcast %79 : vector<16x1xf32> to vector<16x8xf32>
    %81 = arith.select %77, %80, %75 : vector<16x8xi1>, vector<16x8xf32>
    %c3_i32 = arith.constant 3 : i32
    %82 = vector.broadcast %c3_i32 : i32 to vector<16x8xi32>
    %83 = arith.cmpi eq, %64, %82 : vector<16x8xi32>
    %84 = arith.sitofp %25 : vector<16x1xi32> to vector<16x1xf32>
    %85 = vector.shape_cast %84 : vector<16x1xf32> to vector<16x1xf32>
    %86 = vector.broadcast %85 : vector<16x1xf32> to vector<16x8xf32>
    %87 = arith.select %83, %86, %81 : vector<16x8xi1>, vector<16x8xf32>
    %c0_33 = arith.constant 0 : index
    %c0_34 = arith.constant 0 : index
    %88 = vector.load %arg10[%c0_33, %c0_34] : memref<16x8xf32, #tpu.memory_space<vmem>>, vector<16x8xf32>
    tpu.vector_store %arg10[%c0_33, %c0_34], %87 {strides = array<i32>} : memref<16x8xf32, #tpu.memory_space<vmem>>, vector<16x8xf32>,
    return
  }
  func.func @transform_0(%arg0: i32) -> (i32, i32) {
    %c0_i32 = arith.constant 0 : i32
    %c0_i32_0 = arith.constant 0 : i32
    return %arg0, %c0_i32 : i32, i32
  }
  func.func @transform_1(%arg0: i32) -> (i32, i32) {
    %c0_i32 = arith.constant 0 : i32
    %c0_i32_0 = arith.constant 0 : i32
    %c0_i32_1 = arith.constant 0 : i32
    return %c0_i32, %c0_i32_0 : i32, i32
  }
  func.func @transform_2(%arg0: i32) -> (i32, i32) {
    %c0_i32 = arith.constant 0 : i32
    %c0_i32_0 = arith.constant 0 : i32
    %c0_i32_1 = arith.constant 0 : i32
    return %c0_i32, %c0_i32_0 : i32, i32
  }
  func.func @transform_3(%arg0: i32) -> (i32, i32) {
    %c0_i32 = arith.constant 0 : i32
    %c0_i32_0 = arith.constant 0 : i32
    %c0_i32_1 = arith.constant 0 : i32
    return %c0_i32, %c0_i32_0 : i32, i32
  }
  func.func @transform_4(%arg0: i32) -> (i32, i32) {
    %c0_i32 = arith.constant 0 : i32
    %c0_i32_0 = arith.constant 0 : i32
    %c0_i32_1 = arith.constant 0 : i32
    return %c0_i32, %c0_i32_0 : i32, i32
  }
  func.func @transform_5(%arg0: i32) -> (i32, i32) {
    %c0_i32 = arith.constant 0 : i32
    %c0_i32_0 = arith.constant 0 : i32
    %c0_i32_1 = arith.constant 0 : i32
    return %c0_i32, %c0_i32_0 : i32, i32
  }
  func.func @transform_6(%arg0: i32) -> (i32, i32) {
    %c0_i32 = arith.constant 0 : i32
    %c0_i32_0 = arith.constant 0 : i32
    %c0_i32_1 = arith.constant 0 : i32
    return %c0_i32, %c0_i32_0 : i32, i32
  }
  func.func @transform_7(%arg0: i32) -> (i32, i32) {
    %c0_i32 = arith.constant 0 : i32
    %c0_i32_0 = arith.constant 0 : i32
    %c0_i32_1 = arith.constant 0 : i32
    return %c0_i32, %c0_i32_0 : i32, i32
  }
  func.func @transform_8(%arg0: i32) -> (i32, i32) {
    %c0_i32 = arith.constant 0 : i32
    %c0_i32_0 = arith.constant 0 : i32
    return %arg0, %c0_i32 : i32, i32
  }
  func.func @transform_9(%arg0: i32) -> (i32, i32) {
    %c0_i32 = arith.constant 0 : i32
    %c0_i32_0 = arith.constant 0 : i32
    return %arg0, %c0_i32 : i32, i32
  }
}

</mosaic_0001>

<bundles_post_ra>
// kernel: tpu_custom_call.1
= control target key start
LH: loop header
LB: loop body
LE: loop exit
PB: predicated region body
PF: predicated region fallthrough
CT: control target
= control target key end

     0   :  { %s549_s0 = inlined_call_operand.vmem [shape: f32[16,32], index: 0, kind: input, shape index: {}]   ;;  %s550_s1 = inlined_call_operand.vmem [shape: f32[32,32], index: 1, kind: input, shape index: {}]   ;;  %s551_s2 = inlined_call_operand.vmem [shape: f32[1,32], index: 2, kind: input, shape index: {}]   ;;  %s552_s3 = inlined_call_operand.vmem [shape: f32[32,128], index: 3, kind: input, shape index: {}]   ;;  %s553_s4 = inlined_call_operand.vmem [shape: f32[1,128], index: 4, kind: input, shape index: {}]   ;;  %s554_s5 = inlined_call_operand.vmem [shape: f32[128,32], index: 5, kind: input, shape index: {}]   ;;  %s555_s6 = inlined_call_operand.vmem [shape: f32[32,32], index: 6, kind: input, shape index: {}]   ;;  %s556_s7 = inlined_call_operand.vmem [shape: f32[1,32], index: 7, kind: input, shape index: {}]   ;;  %s557_s8 = inlined_call_operand.hbm [shape: f32[16,32], index: 8, kind: output, shape index: {0}]   ;;  %s558_s9 = inlined_call_operand.vmem [shape: f32[16,8], index: 9, kind: output, shape index: {1}]  }
   0x1   :  { %v37_v0 = vld [vmem:[%s550_s1 + $0x18] sm:$0xff]  ;;  %v36_v1 = vld [vmem:[%s550_s1 + $0x10] sm:$0xff]  ;;  %v35_v2 = vld [vmem:[%s550_s1 + $0x8] sm:$0xff] }
   0x2   :  { %61 = vmatpush.msra.mxu0 %v37_v0  ;;  %v76_v3 = vld [vmem:[%s552_s3 + $0x18] sm:$0xff]  ;;  %v75_v4 = vld [vmem:[%s552_s3 + $0x10] sm:$0xff]  ;;  %v34_v5 = vld [vmem:[%s550_s1] sm:$0xff] }
   0x3   :  { %95 = vmatpush.msra.mxu1 %v76_v3 }
   0x4   :  { %62 = vmatpush.msra.mxu0 %v36_v1 }
   0x5   :  { %15 = vsyncpa [#allocation3], 0  ;;  %v32_v6 = vld [vmem:[%s549_s0] sm:$0xff]  ;;  %vm42_vm0 = vcmask 261120   ;;  %96 = vmatpush.msra.mxu1 %v75_v4  ;;  %v33_v7 = vld [vmem:[%s549_s0 + $0x8] sm:$0xff]  ;;  %v113_v10 = vlaneseq  ;;  %v339_v59 = vmov 1.0  }
   0x6   :  { %63 = vmatpush.msra.mxu0 %v35_v2  ;;  %v74_v8 = vld [vmem:[%s552_s3 + $0x8] sm:$0xff]  ;;  %v73_v9 = vld [vmem:[%s552_s3] sm:$0xff]  ;;  %v190_v28 = vld [vmem:[%s554_s5 + $0x78] sm:$0xff]  ;;  %vm269_vm13 = vcmask 64512   ;;  %s341_s28 = smov 128   ;;  %s342_s29 = smov 8  }
   0x7   :  { %97 = vmatpush.msra.mxu1 %v74_v8  ;;  %v310_v11 = vld [vmem:[%s551_s2] ss:$0 sm:$0xff]  ;;  %v428_v12 = vand.u32 127, %v113_v10  ;;  %v189_v29 = vld [vmem:[%s554_s5 + $0x70] sm:$0xff]  ;;  %191 = vmatpush.msra.mxu2 %v190_v28  ;;  %v188_v32 = vld [vmem:[%s554_s5 + $0x68] sm:$0xff] }
   0x8   :  { %64 = vmatpush.msra.mxu0 %v34_v5  ;;  %v311_v23 = vld [vmem:[%s553_s4] ss:$0 sm:$0xff]  ;;  %v186_v38 = vld [vmem:[%s554_s5 + $0x58] sm:$0xff]  ;;  %v185_v39 = vld [vmem:[%s554_s5 + $0x50] sm:$0xff] }
   0x9   :  { %294 = vmatmul.msk.f32.vlgmr.msra.gmra.mxu0 %vm42_vm0, %v32_v6  ;;  %98 = vmatpush.msra.mxu1 %v73_v9  ;;  %vm140_vm1 = vcmp.lt.s32.totalorder %v428_v12, 16  ;;  %vm115_vm2 = vcmp.lt.s32.totalorder %v428_v12, 64  ;;  %v187_v34 = vld [vmem:[%s554_s5 + $0x60] sm:$0xff]  ;;  %v184_v40 = vld [vmem:[%s554_s5 + $0x48] sm:$0xff]  ;;  %v182_v43 = vld [vmem:[%s554_s5 + $0x38] sm:$0xff]  ;;  %vm253_vm9 = vcmp.eq.s32.totalorder %v428_v12, 0 }
   0xa   :  { %192 = vmatpush.msra.mxu2 %v189_v29  ;;  %v183_v41 = vld [vmem:[%s554_s5 + $0x40] sm:$0xff]  ;;  %v181_v44 = vld [vmem:[%s554_s5 + $0x30] sm:$0xff]  ;;  %v180_v45 = vld [vmem:[%s554_s5 + $0x28] sm:$0xff]  ;;  %vm256_vm10 = vcmp.eq.s32.totalorder %v428_v12, 1  ;;  %vm259_vm11 = vcmp.eq.s32.totalorder %v428_v12, 2  ;;  %vm264_vm12 = vcmp.eq.s32.totalorder %v428_v12, 3 }
   0xb   :  { %v179_v47 = vld [vmem:[%s554_s5 + $0x20] sm:$0xff]  ;;  %v178_v48 = vld [vmem:[%s554_s5 + $0x18] sm:$0xff]  ;;  %v177_v49 = vld [vmem:[%s554_s5 + $0x10] sm:$0xff] }
   0xc   :  { %193 = vmatpush.msra.mxu2 %v188_v32  ;;  %v176_v50 = vld [vmem:[%s554_s5 + $0x8] sm:$0xff]  ;;  %v175_v51 = vld [vmem:[%s554_s5] sm:$0xff]  ;;  %v217_v57 = vld [vmem:[%s555_s6 + $0x18] sm:$0xff] }
   0xd   :  { %v216_v58 = vld [vmem:[%s555_s6 + $0x10] sm:$0xff]  ;;  %240 = vmatpush.msra.mxu3 %v217_v57  ;;  %v215_v60 = vld [vmem:[%s555_s6 + $0x8] sm:$0xff]  ;;  %v214_v29 = vld [vmem:[%s555_s6] sm:$0xff]  ;;  %s278_s6 = sshll.u32 %s557_s8, 4  ;;  %s279_s6 = int_to_ptr.hbm [resolvable:$true] %s278_s6 }
   0xe   :  { %194 = vmatpush.msra.mxu2 %v187_v34 }
   0xf   :  { %241 = vmatpush.msra.mxu3 %v216_v58 }
  0x10   :  { %195 = vmatpush.msra.mxu2 %v186_v38 }
  0x11   :  { %295 = vmatmul.msk.f32.gmra.mxu0 %vm42_vm0, %v33_v7  ;;  %242 = vmatpush.msra.mxu3 %v215_v60 }
  0x12   :  { %196 = vmatpush.msra.mxu2 %v185_v39 }
  0x13   :  { %243 = vmatpush.msra.mxu3 %v214_v29 }
  0x14   :  { %197 = vmatpush.msra.mxu2 %v184_v40 }
  0x16   :  { %198 = vmatpush.msra.mxu2 %v183_v41 }
  0x18   :  { %199 = vmatpush.msra.mxu2 %v182_v43 }
  0x1a   :  { %200 = vmatpush.msra.mxu2 %v181_v44 }
  0x1c   :  { %201 = vmatpush.msra.mxu2 %v180_v45 }
  0x1e   :  { %202 = vmatpush.msra.mxu2 %v179_v47 }
  0x20   :  { %203 = vmatpush.msra.mxu2 %v178_v48 }
  0x22   :  { %204 = vmatpush.msra.mxu2 %v177_v49 }
  0x24   :  { %205 = vmatpush.msra.mxu2 %v176_v50 }
  0x26   :  { %206 = vmatpush.msra.mxu2 %v175_v51 }
  0x86   :  { %v66_v13 = vpop.f32.mrf.mxu0 }
  0x87   :  { %v67_v14 = vadd.f32 %v310_v11, %v66_v13 }
  0x89   :  { %v138_v15 = vmul.f32 %v67_v14, %v67_v14  ;;  %296 = vmatmul.msk.f32.vlgmr.msra.gmra.mxu1 %vm42_vm0, %v67_v14 }
  0x8b   :  { %v141_v16 = vsel %vm140_vm1, %v138_v15, 0.0  ;;  %v149_v42 = vsel %vm42_vm0, %v138_v15, 0.0 }
  0x8c   :  { %v143_v17 = vsel %vm42_vm0, %v141_v16, 0.0 }
  0x8d   :  { %144 = vadd.xlane.f32.xlu2 %v143_v17 }
  0x8e   :  { %v69_v18 = vpop.f32.mrf.mxu0 }
  0x8f   :  { %v70_v19 = vadd.f32 %v310_v11, %v69_v18 }
  0x91   :  { %v139_v20 = vmul.f32 %v70_v19, %v70_v19  ;;  %297 = vmatmul.msk.f32.gmra.mxu1 %vm42_vm0, %v70_v19 }
  0x93   :  { %v142_v21 = vsel %vm140_vm1, %v139_v20, 0.0  ;;  %v152_v46 = vsel %vm42_vm0, %v139_v20, 0.0 }
  0x94   :  { %v146_v22 = vsel %vm42_vm0, %v142_v21, 0.0 }
  0x95   :  { %147 = vadd.xlane.f32.xlu2 %v146_v22 }
 0x100   :  { %v145_v52 = vpop.xlane.xlu2 %144 }
 0x106   :  { %v100_v24 = vpop.f32.mrf.mxu1 }
 0x107   :  { %v106_v25 = vmul.f32 2.0, %v100_v24 }
 0x108   :  { %v148_v55 = vpop.xlane.xlu2 %147 }
 0x109   :  { %v111_v26 = vsub.f32 %v311_v23, %v106_v25 }
 0x10b   :  { %v116_v27 = vsel %vm115_vm2, %v111_v26, 1e+30  ;;  %v118_v35 = vsel %vm115_vm2, 1e+30, %v111_v26 }
 0x10c   :  { %130 = vmin.xlane.f32.xlu2 %v116_v27  ;;  %120 = vmin.index.xlane.f32.xlu0 %v116_v27 }
 0x10e   :  { %v103_v30 = vpop.f32.mrf.mxu1 }
 0x10f   :  { %v107_v31 = vmul.f32 2.0, %v103_v30 }
 0x111   :  { %v112_v33 = vsub.f32 %v311_v23, %v107_v31 }
 0x113   :  { %v119_v36 = vsel %vm115_vm2, 1e+30, %v112_v33  ;;  %v117_v37 = vsel %vm115_vm2, %v112_v33, 1e+30 }
 0x114   :  { %124 = vmin.index.xlane.f32.xlu0 %v118_v35  ;;  %136 = vmin.xlane.f32.xlu2 %v119_v36 }
 0x115   :  { %122 = vmin.index.xlane.f32.xlu1 %v117_v37 }
 0x11c   :  { %150 = vadd.xlane.f32.xlu0 %v149_v42 }
 0x11d   :  { %126 = vmin.index.xlane.f32.xlu1 %v119_v36 }
 0x124   :  { %132 = vmin.xlane.f32.xlu0 %v117_v37 }
 0x125   :  { %153 = vadd.xlane.f32.xlu1 %v152_v46 }
 0x12d   :  { %134 = vmin.xlane.f32.xlu1 %v118_v35 }
 0x17f   :  { %v121_v53 = vpop.xlane.xlu0 %120  ;;  %v131_v62 = vpop.xlane.xlu2 %130 }
 0x180   :  { %vm165_vm3 = vcmp.eq.s32.totalorder %v428_v12, %v121_v53  ;;  %v157_v8 = vadd.f32 %v145_v52, %v131_v62  ;;  %v260_v24 = vcvt.s32.f32 %v121_v53 }
 0x182   :  { %v159_v16 = vmul.f32 0.078125, %v157_v8 }
 0x184   :  { %v254_v23 = vsel %vm253_vm9, %v159_v16, 0.0 }
 0x187   :  { %v125_v54 = vpop.xlane.xlu0 %124  ;;  %v137_v4 = vpop.xlane.xlu2 %136 }
 0x188   :  { %vm167_vm4 = vcmp.eq.s32.totalorder %v428_v12, %v125_v54  ;;  %v123_v56 = vpop.xlane.xlu1 %122  ;;  %v298_v19 = vadd.s32 4294967232, %v125_v54 }
 0x189   :  { %vm169_vm5 = vmor %vm165_vm3, %vm167_vm4  ;;  %vm166_vm6 = vcmp.eq.s32.totalorder %v428_v12, %v123_v56  ;;  %v261_v11 = vcvt.s32.f32 %v123_v56 }
 0x18a   :  { %302 = vmatmul.msk.f32.vlgmr.msra.gmra.mxu2 %vm169_vm5, %v339_v59  ;;  %v265_v25 = vcvt.s32.f32 %v298_v19 }
 0x18f   :  { %v151_v61 = vpop.xlane.xlu0 %150 }
 0x190   :  { %v127_v63 = vpop.xlane.xlu1 %126  ;;  %v155_v13 = vsub.f32 %v151_v61, %v145_v52 }
 0x191   :  { %vm168_vm7 = vcmp.eq.s32.totalorder %v428_v12, %v127_v63  ;;  %v299_v6 = vadd.s32 4294967232, %v127_v63  ;;  %v312_v12 = vld [vmem:[%s556_s7] ss:$0 sm:$0xff] }
 0x192   :  { %vm170_vm8 = vmor %vm166_vm6, %vm168_vm7 }
 0x193   :  { %303 = vmatmul.msk.f32.gmra.mxu2 %vm170_vm8, %v339_v59  ;;  %v266_v14 = vcvt.s32.f32 %v299_v6 }
 0x197   :  { %v133_v0 = vpop.xlane.xlu0 %132 }
 0x198   :  { %v158_v1 = vadd.f32 %v148_v55, %v133_v0  ;;  %v154_v2 = vpop.xlane.xlu1 %153 }
 0x199   :  { %v156_v3 = vsub.f32 %v154_v2, %v148_v55 }
 0x19a   :  { %v160_v5 = vmul.f32 0.078125, %v158_v1 }
 0x19b   :  { %v162_v7 = vadd.f32 %v156_v3, %v137_v4 }
 0x19c   :  { %v255_v9 = vsel %vm253_vm9, %v160_v5, 0.0 }
 0x19d   :  { %v164_v10 = vmul.f32 0.078125, %v162_v7 }
 0x19f   :  { %v258_v15 = vsel %vm256_vm10, %v164_v10, %v255_v9 }
 0x1a0   :  { %v263_v17 = vsel %vm259_vm11, %v261_v11, %v258_v15  ;;  %v135_v18 = vpop.xlane.xlu1 %134 }
 0x1a1   :  { %v268_v20 = vsel %vm264_vm12, %v266_v14, %v263_v17  ;;  %v161_v21 = vadd.f32 %v155_v13, %v135_v18 }
 0x1a2   :  { %271 = vst.msk [vmem:[%s558_s9 + $0x8] sm:$0xff] %vm269_vm13, %v268_v20 }
 0x1a3   :  { %v163_v22 = vmul.f32 0.078125, %v161_v21 }
 0x1a5   :  { %v257_v26 = vsel %vm256_vm10, %v163_v22, %v254_v23 }
 0x1a6   :  { %v262_v27 = vsel %vm259_vm11, %v260_v24, %v257_v26 }
 0x1a7   :  { %v267_v28 = vsel %vm264_vm12, %v265_v25, %v262_v27 }
 0x1a8   :  { %270 = vst.msk [vmem:[%s558_s9] sm:$0xff] %vm269_vm13, %v267_v28  ;;  %s340_s9 = smov [#allocation2]  }
 0x1a9   :  { %s276_s26 = sshll.u32 %s340_s9, 4  ;;  %s277_s26 = int_to_ptr.vmem [resolvable:$true] %s276_s26 }
 0x20d   :  { %v208_v30 = vpop.f32.mrf.mxu2 }
 0x20e   :  { %304 = vmatmul.msk.f32.vlgmr.msra.gmra.mxu3 %vm42_vm0, %v208_v30 }
 0x216   :  { %v211_v31 = vpop.f32.mrf.mxu2 }
 0x217   :  { %305 = vmatmul.msk.f32.gmra.mxu3 %vm42_vm0, %v211_v31 }
 0x291   :  { %v245_v32 = vpop.f32.mrf.mxu3 }
 0x292   :  { %v246_v33 = vadd.f32 %v312_v12, %v245_v32 }
 0x294   :  { %251 = vst.msk [vmem:[#allocation2] sm:$0xff] %vm42_vm0, %v246_v33 }
 0x29a   :  { %v248_v34 = vpop.f32.mrf.mxu3 }
 0x29b   :  { %v249_v35 = vadd.f32 %v312_v12, %v248_v34 }
 0x29d   :  { %252 = vst.msk [vmem:[#allocation2 + $0x8] sm:$0xff] %vm42_vm0, %v249_v35 }
 0x29e   :  { %284 = dma.vmem_to_hbm [thread:$0]  %s277_s26, 256, %s279_s6, [#allocation3], %s341_s28, %s341_s28, %s342_s29  }
 0x29f   :  { %337 = dma.done.wait [#allocation3], 256  }
 0x2a0   :  { %338 = vsyncadd [#allocation3], 4294967040 }
 0x2a1   :  { %293 = vsyncpa [#allocation3], 1 }

</bundles_post_ra>
